<compile_context>
chip_gen: v7x
topology: tpu7x:2x2x1
jax: 0.10.0
libtpu: 0.0.40
codegen_flags: <defaults>
</compile_context>

<pallas_src>
import numpy as np
import jax
import jax.numpy as jnp
from jax.experimental import pallas as pl
from jax.experimental.pallas import tpu as pltpu


_LANES = 128                    # lane width (minor-dim tile) for the 2-D slab
_ROW_ALIGN = 8                  # sublane alignment for leading-dim DMA slices
_MAX_DMA_CHUNKS = 8             # concurrent DMAs for large copies
_MIN_BYTES_TO_CHUNK = 1 << 20   # below 1 MiB a single DMA is already optimal


def _resolve_shape(shape, numel):
    """Resolve a single -1 in the target shape (torch.view semantics)."""
    shape = list(shape)
    if -1 in shape:
        idx = shape.index(-1)
        known = 1
        for s in shape:
            if s != -1:
                known *= int(s)
        assert known > 0 and numel % known == 0, "view: cannot infer -1 dimension"
        shape[idx] = numel // known
    assert int(np.prod(shape)) == numel, "view: shape incompatible with numel"
    return tuple(int(s) for s in shape)


def _make_dma_copy_kernel(chunks):
    """Build a kernel that DMA-copies `chunks` of the input HBM ref to output."""
    single = len(chunks) == 1

    def kernel(x_hbm, o_hbm, sem):
        copies = []
        for i, (start, size) in enumerate(chunks):
            if single:
                src, dst = x_hbm, o_hbm                 # whole-array copy
            else:
                src = x_hbm.at[pl.ds(start, size)]      # leading-dim slice
                dst = o_hbm.at[pl.ds(start, size)]
            cp = pltpu.make_async_copy(src, dst, sem.at[i])
            cp.start()
            copies.append(cp)
        for cp in copies:                               # drain all in-flight DMAs
            cp.wait()

    return kernel


def view_pallas(x, shape):
    """Equivalent of torch `x.view(*shape)`; data path is HBM->HBM DMA."""
    numel = int(np.prod(x.shape))
    out_shape = _resolve_shape(shape, numel)
    itemsize = jnp.dtype(x.dtype).itemsize
    total_bytes = numel * itemsize

    # Lane-dense 2-D slab when possible (free, row-major reshape); otherwise a
    # flat 1-D buffer.  No padding and no post-kernel slicing in either case.
    if numel % _LANES == 0:
        slab_shape = (numel // _LANES, _LANES)
    else:
        slab_shape = (numel,)
    lead = slab_shape[0]

    # Static DMA chunking: large tensors get up to 8 concurrent, 8-row-aligned
    # chunks along the leading dim; small tensors use one whole-array DMA.
    if (total_bytes >= _MIN_BYTES_TO_CHUNK and len(slab_shape) == 2
            and lead >= _MAX_DMA_CHUNKS * _ROW_ALIGN):
        per = -(-lead // _MAX_DMA_CHUNKS)                   # ceil
        per = -(-per // _ROW_ALIGN) * _ROW_ALIGN            # round up to 8 rows
        chunks, r = [], 0
        while r < lead:
            size = min(per, lead - r)
            chunks.append((r, size))
            r += size
    else:
        chunks = [(0, lead)]

    slab = jnp.reshape(x, slab_shape)   # metadata-only for contiguous input

    out = pl.pallas_call(
        _make_dma_copy_kernel(tuple(chunks)),
        out_shape=jax.ShapeDtypeStruct(slab_shape, x.dtype),
        in_specs=[pl.BlockSpec(memory_space=pl.ANY)],
        out_specs=pl.BlockSpec(memory_space=pl.ANY),
        scratch_shapes=[pltpu.SemaphoreType.DMA((len(chunks),))],
        cost_estimate=pl.CostEstimate(
            flops=0, transcendentals=0, bytes_accessed=2 * total_bytes),
    )(slab)

    return jnp.reshape(out, out_shape)  # metadata-only


_view_pallas_jit = jax.jit(view_pallas, static_argnums=1)


class View:
    """JAX/Pallas equivalent of the PyTorch View module."""

    def __init__(self, shape: tuple):
        self.shape = tuple(shape)

    def __call__(self, x):
        return _view_pallas_jit(x, self.shape)


if __name__ == "__main__":
    key = jax.random.PRNGKey(0)

    # 1) Typical GAN usage: flatten conv features (N, C, H, W) -> (N, C*H*W).
    #    Small tensor -> single whole-array HBM->HBM DMA.
    x = jax.random.normal(key, (2, 4, 16, 16), dtype=jnp.float32)
    y = View((-1, 4 * 16 * 16))(x)
    y = jax.block_until_ready(y)
    assert y.shape == (2, 1024), y.shape
    np.testing.assert_array_equal(
        np.asarray(y), np.asarray(jnp.reshape(x, (2, 1024))))

    # 2) 2 MiB tensor -> exercises the chunked multi-DMA path (8 DMAs in flight).
    x2 = jax.random.normal(key, (8, 64, 32, 32), dtype=jnp.float32)
    y2 = View((8, -1))(x2)
    y2 = jax.block_until_ready(y2)
    assert y2.shape == (8, 64 * 32 * 32), y2.shape
    np.testing.assert_array_equal(
        np.asarray(y2), np.asarray(jnp.reshape(x2, (8, 64 * 32 * 32))))

    print("KERNEL_OK")
</pallas_src>

<mosaic_0001>
module attributes {stable_mosaic.version = 11 : i64} {
  func.func @kernel(%arg0: memref<16x128xf32, #tpu.memory_space<any>>, %arg1: memref<16x128xf32, #tpu.memory_space<any>>, %arg2: memref<1x!tpu.dma_semaphore, #tpu.memory_space<semaphore_mem>>) attributes {dimension_semantics = [], scalar_prefetch = 0 : i64, scratch_operands = 1 : i64, tpu.core_type = #tpu.core_type<tc>} {
    %c0_i32 = arith.constant 0 : i32
    %0 = tpu.memref_slice %arg2[%c0_i32] : memref<1x!tpu.dma_semaphore, #tpu.memory_space<semaphore_mem>> -> memref<1x!tpu.dma_semaphore, #tpu.memory_space<semaphore_mem>>
    %1 = tpu.memref_squeeze %0 : memref<1x!tpu.dma_semaphore, #tpu.memory_space<semaphore_mem>> -> memref<!tpu.dma_semaphore, #tpu.memory_space<semaphore_mem>>
    tpu.enqueue_dma source(%arg0 : memref<16x128xf32, #tpu.memory_space<any>>) target(%arg1 : memref<16x128xf32, #tpu.memory_space<any>>) target_semaphore(%1 : memref<!tpu.dma_semaphore, #tpu.memory_space<semaphore_mem>>)
    %c0_i32_0 = arith.constant 0 : i32
    %2 = tpu.memref_slice %arg2[%c0_i32_0] : memref<1x!tpu.dma_semaphore, #tpu.memory_space<semaphore_mem>> -> memref<1x!tpu.dma_semaphore, #tpu.memory_space<semaphore_mem>>
    %3 = tpu.memref_squeeze %2 : memref<1x!tpu.dma_semaphore, #tpu.memory_space<semaphore_mem>> -> memref<!tpu.dma_semaphore, #tpu.memory_space<semaphore_mem>>
    tpu.wait_dma2 semaphore(%3 : memref<!tpu.dma_semaphore, #tpu.memory_space<semaphore_mem>>) src(%arg0 : memref<16x128xf32, #tpu.memory_space<any>>) dst(%arg1 : memref<16x128xf32, #tpu.memory_space<any>>)
    return
  }
}

</mosaic_0001>

<bundles_post_ra>
// kernel: view_pallas.1
= control target key start
LH: loop header
LB: loop body
LE: loop exit
PB: predicated region body
PF: predicated region fallthrough
CT: control target
= control target key end

     0   :  { %s92_s0 = inlined_call_operand.vmem [shape: f32[16,128], index: 0, kind: input, shape index: {}]   ;;  %s93_s1 = inlined_call_operand.vmem [shape: f32[16,128], index: 1, kind: output, shape index: {}]  }
   0x1   :  { %v38_v0 = vld [vmem:[%s92_s0] sm:$0xff]  ;;  %v40_v1 = vld [vmem:[%s92_s0 + $0x8] sm:$0xff] }
   0x2   :  { %39 = vst [vmem:[%s93_s1] sm:$0xff] %v38_v0  ;;  %41 = vst [vmem:[%s93_s1 + $0x8] sm:$0xff] %v40_v1 }
   0x3   :  { %49 = vsyncadd [#allocation2], 256 }
   0x4   :  { %68 = dma.done.wait [#allocation2], 256 }
   0x5   :  { %69 = vsyncadd [#allocation2], 4294967040 }
   0x6   :  { %53 = vsyncmov [#allocation2] }
   0x9   :  { %s54_s14 = vpop.sfrf %53 }
   0xa   :  { %p67_p0 = scmp.ne.s32.totalorder %s54_s14, 0 }
   0xc   :  { %58 = shalt.err (%p67_p0)  }

</bundles_post_ra>
